<compile_context>
chip_gen: v7x
topology: tpu7x:2x2x1
jax: 0.10.0
libtpu: 0.0.40
codegen_flags: <defaults>
</compile_context>

<pallas_src>
import functools

import jax
import jax.numpy as jnp
from jax.experimental import pallas as pl
from jax.experimental.pallas import tpu as pltpu

LANES = 128
SUBLANES = 8
MAX_TILE_ROWS = 2048          # 2048 x 128 x 4B = 1 MiB per block per stream
SMOOTH = 1.0
NEG_FILL = -1e4               # sigmoid(-1e4) == 0.0 in f32 (and via bf16 cast)


def _dice_kernel(pred_ref, targ_ref, out_ref):
    """Accumulate (intersection, pred-sum, target-sum) vector partials."""
    i = pl.program_id(1)      # inner (reduction) axis

    @pl.when(i == 0)
    def _():
        out_ref[...] = jnp.zeros_like(out_ref)

    # Hot path: cast -> sigmoid (EUP) -> multiply/add (VPU).  Keep the f32
    # cast inside the kernel (v5e VPU/EUP have no bf16 path).
    p = jax.nn.sigmoid(pred_ref[...].astype(jnp.float32))
    t = targ_ref[...].astype(jnp.float32)

    tile_rows = p.shape[0]
    # Tile-aligned reshape: (tile_rows, 128) -> (tile_rows//8, 8, 128); the
    # axis-0 sum is then plain vreg-wise VPU adds (no XLU cross-lane reduce).
    p3 = p.reshape(tile_rows // SUBLANES, SUBLANES, LANES)
    t3 = t.reshape(tile_rows // SUBLANES, SUBLANES, LANES)

    out_ref[0, 0] += jnp.sum(p3 * t3, axis=0)   # intersection partials
    out_ref[0, 1] += jnp.sum(p3, axis=0)        # pred.sum() partials
    out_ref[0, 2] += jnp.sum(t3, axis=0)        # target.sum() partials


def _round_up(x, m):
    return ((x + m - 1) // m) * m


def _choose_tiling(rows):
    """Pick (tile_rows, n_outer, n_inner, rows_padded) from the row count."""
    tile_rows = min(MAX_TILE_ROWS, _round_up(rows, SUBLANES))
    n_tiles = pl.cdiv(rows, tile_rows)
    n_outer = 2 if n_tiles >= 2 else 1   # 2-way split feeds both v7x TCs
    n_inner = pl.cdiv(n_tiles, n_outer)
    rows_padded = n_outer * n_inner * tile_rows
    return tile_rows, n_outer, n_inner, rows_padded


def _flatten_pad(x, total, rows_padded, fill):
    """Flatten to (rows_padded, 128) in native dtype; pad only if needed."""
    flat = jnp.reshape(x, (-1,))
    pad = rows_padded * LANES - total
    if pad:
        flat = jnp.pad(flat, (0, pad), constant_values=fill)
    return jnp.reshape(flat, (rows_padded, LANES))


@functools.partial(jax.jit, static_argnames=("num_classes",))
def dice_loss(pred, target, num_classes=1):
    """Pallas implementation of DiceLoss.forward (num_classes == 1 path)."""
    if num_classes != 1:
        # TODO(synk): multi-class softmax Dice branch not implemented.
        raise NotImplementedError("only num_classes=1 is implemented")

    # target.squeeze(1) then .view(-1): identical flat element order to pred.
    total = pred.size
    rows = pl.cdiv(total, LANES)
    tile_rows, n_outer, n_inner, rows_padded = _choose_tiling(rows)

    pred2d = _flatten_pad(pred, total, rows_padded, fill=NEG_FILL)
    targ2d = _flatten_pad(target, total, rows_padded, fill=0)

    tile_spec = pl.BlockSpec((tile_rows, LANES),
                             lambda o, i: (o * n_inner + i, 0))

    partials = pl.pallas_call(
        _dice_kernel,
        out_shape=jax.ShapeDtypeStruct((n_outer, 3, SUBLANES, LANES),
                                       jnp.float32),
        grid_spec=pltpu.PrefetchScalarGridSpec(
            num_scalar_prefetch=0,
            grid=(n_outer, n_inner),
            in_specs=[tile_spec, tile_spec],
            out_specs=pl.BlockSpec((1, 3, SUBLANES, LANES),
                                   lambda o, i: (o, 0, 0, 0)),
        ),
        compiler_params=pltpu.CompilerParams(
            dimension_semantics=("parallel", "arbitrary")),
    )(pred2d, targ2d)

    # Tiny epilogue: combine per-core / per-lane partials, apply dice formula.
    sums = jnp.sum(partials, axis=(0, 2, 3))          # (3,) f32
    intersection, psum, tsum = sums[0], sums[1], sums[2]
    return 1.0 - (2.0 * intersection + SMOOTH) / (psum + tsum + SMOOTH)


def dice_loss_ref(pred, target):
    """Pure-JAX reference mirroring the PyTorch forward (num_classes=1)."""
    target = jnp.squeeze(target, axis=1)
    p = jax.nn.sigmoid(pred.astype(jnp.float32)).reshape(-1)
    t = target.astype(jnp.float32).reshape(-1)
    intersection = jnp.sum(p * t)
    union = jnp.sum(p) + jnp.sum(t)
    return 1.0 - (2.0 * intersection + SMOOTH) / (union + SMOOTH)


if __name__ == "__main__":
    key = jax.random.PRNGKey(0)

    # Main test: (N, 1, H, W) logits, binary target mask.
    k1, k2, k3, k4 = jax.random.split(key, 4)
    N, C, H, W = 2, 1, 16, 16
    pred = jax.random.normal(k1, (N, C, H, W), dtype=jnp.float32)
    target = (jax.random.uniform(k2, (N, 1, H, W)) > 0.5).astype(jnp.float32)

    loss = jax.block_until_ready(dice_loss(pred, target))
    ref = jax.block_until_ready(dice_loss_ref(pred, target))
    assert jnp.allclose(loss, ref, rtol=1e-5, atol=1e-5), (loss, ref)

    # Ragged-size test: element count NOT a multiple of 1024 -> exercises the
    # negative-fill padding path (validates the mask-free design).
    pred_r = jax.random.normal(k3, (2, 1, 13, 7), dtype=jnp.float32)
    target_r = (jax.random.uniform(k4, (2, 1, 13, 7)) > 0.5).astype(jnp.float32)
    loss_r = jax.block_until_ready(dice_loss(pred_r, target_r))
    ref_r = jax.block_until_ready(dice_loss_ref(pred_r, target_r))
    assert jnp.allclose(loss_r, ref_r, rtol=1e-5, atol=1e-5), (loss_r, ref_r)

    print("KERNEL_OK")
</pallas_src>

<mosaic_0001>
module attributes {stable_mosaic.version = 11 : i64} {
  func.func @_dice_kernel(%arg0: i32, %arg1: i32, %arg2: memref<8x128xf32, #tpu.memory_space<vmem>>, %arg3: memref<8x128xf32, #tpu.memory_space<vmem>>, %arg4: memref<1x3x8x128xf32, #tpu.memory_space<vmem>>) attributes {dimension_semantics = [#tpu.dimension_semantics<parallel>, #tpu.dimension_semantics<arbitrary>], iteration_bounds = array<i64: 1, 1>, scalar_prefetch = 0 : i64, scratch_operands = 0 : i64, tpu.core_type = #tpu.core_type<tc>, window_params = [{transform_indices = @transform_0, window_bounds = array<i64: 8, 128>}, {transform_indices = @transform_1, window_bounds = array<i64: 8, 128>}, {transform_indices = @transform_2, window_bounds = array<i64: 1, 3, 8, 128>}]} {
    %c0_i32 = arith.constant 0 : i32
    %0 = arith.cmpi eq, %arg1, %c0_i32 : i32
    %1 = arith.extui %0 : i1 to i32
    %c0_i32_0 = arith.constant 0 : i32
    %2 = arith.cmpi ne, %1, %c0_i32_0 : i32
    scf.if %2 {
      %cst_29 = arith.constant 0.000000e+00 : f32
      %34 = vector.broadcast %cst_29 : f32 to vector<1x3x8x128xf32>
      %c0_30 = arith.constant 0 : index
      %c0_31 = arith.constant 0 : index
      %c0_32 = arith.constant 0 : index
      %c0_33 = arith.constant 0 : index
      %35 = vector.load %arg4[%c0_30, %c0_31, %c0_32, %c0_33] : memref<1x3x8x128xf32, #tpu.memory_space<vmem>>, vector<1x3x8x128xf32>
      tpu.vector_store %arg4[%c0_30, %c0_31, %c0_32, %c0_33], %34 {strides = array<i32>} : memref<1x3x8x128xf32, #tpu.memory_space<vmem>>, vector<1x3x8x128xf32>,
    } else {
    }
    %c0 = arith.constant 0 : index
    %c0_1 = arith.constant 0 : index
    %3 = vector.load %arg2[%c0, %c0_1] : memref<8x128xf32, #tpu.memory_space<vmem>>, vector<8x128xf32>
    %4 = arith.negf %3 : vector<8x128xf32>
    %5 = math.exp %4 : vector<8x128xf32>
    %cst = arith.constant 1.000000e+00 : f32
    %6 = vector.broadcast %cst : f32 to vector<8x128xf32>
    %7 = arith.addf %6, %5 : vector<8x128xf32>
    %8 = arith.divf %6, %7 : vector<8x128xf32>
    %c0_2 = arith.constant 0 : index
    %c0_3 = arith.constant 0 : index
    %9 = vector.load %arg3[%c0_2, %c0_3] : memref<8x128xf32, #tpu.memory_space<vmem>>, vector<8x128xf32>
    %10 = vector.shape_cast %8 : vector<8x128xf32> to vector<1x8x128xf32>
    %11 = vector.shape_cast %9 : vector<8x128xf32> to vector<1x8x128xf32>
    %c0_4 = arith.constant 0 : index
    %c0_5 = arith.constant 0 : index
    %c0_6 = arith.constant 0 : index
    %c0_7 = arith.constant 0 : index
    %12 = vector.load %arg4[%c0_4, %c0_5, %c0_6, %c0_7] : memref<1x3x8x128xf32, #tpu.memory_space<vmem>>, vector<1x1x8x128xf32>
    %13 = vector.shape_cast %12 : vector<1x1x8x128xf32> to vector<8x128xf32>
    %14 = arith.mulf %10, %11 : vector<1x8x128xf32>
    %cst_8 = arith.constant dense<0.000000e+00> : vector<8x128xf32>
    %15 = vector.multi_reduction <add>, %14, %cst_8 [0] : vector<1x8x128xf32> to vector<8x128xf32>
    %16 = arith.addf %13, %15 : vector<8x128xf32>
    %c0_9 = arith.constant 0 : index
    %c0_10 = arith.constant 0 : index
    %c0_11 = arith.constant 0 : index
    %c0_12 = arith.constant 0 : index
    %17 = vector.load %arg4[%c0_9, %c0_10, %c0_11, %c0_12] : memref<1x3x8x128xf32, #tpu.memory_space<vmem>>, vector<1x1x8x128xf32>
    %18 = vector.shape_cast %17 : vector<1x1x8x128xf32> to vector<8x128xf32>
    %19 = vector.shape_cast %16 : vector<8x128xf32> to vector<1x1x8x128xf32>
    tpu.vector_store %arg4[%c0_9, %c0_10, %c0_11, %c0_12], %19 {strides = array<i32>} : memref<1x3x8x128xf32, #tpu.memory_space<vmem>>, vector<1x1x8x128xf32>,
    %c0_13 = arith.constant 0 : index
    %c1 = arith.constant 1 : index
    %c0_14 = arith.constant 0 : index
    %c0_15 = arith.constant 0 : index
    %20 = vector.load %arg4[%c0_13, %c1, %c0_14, %c0_15] : memref<1x3x8x128xf32, #tpu.memory_space<vmem>>, vector<1x1x8x128xf32>
    %21 = vector.shape_cast %20 : vector<1x1x8x128xf32> to vector<8x128xf32>
    %cst_16 = arith.constant dense<0.000000e+00> : vector<8x128xf32>
    %22 = vector.multi_reduction <add>, %10, %cst_16 [0] : vector<1x8x128xf32> to vector<8x128xf32>
    %23 = arith.addf %21, %22 : vector<8x128xf32>
    %c0_17 = arith.constant 0 : index
    %c1_18 = arith.constant 1 : index
    %c0_19 = arith.constant 0 : index
    %c0_20 = arith.constant 0 : index
    %24 = vector.load %arg4[%c0_17, %c1_18, %c0_19, %c0_20] : memref<1x3x8x128xf32, #tpu.memory_space<vmem>>, vector<1x1x8x128xf32>
    %25 = vector.shape_cast %24 : vector<1x1x8x128xf32> to vector<8x128xf32>
    %26 = vector.shape_cast %23 : vector<8x128xf32> to vector<1x1x8x128xf32>
    tpu.vector_store %arg4[%c0_17, %c1_18, %c0_19, %c0_20], %26 {strides = array<i32>} : memref<1x3x8x128xf32, #tpu.memory_space<vmem>>, vector<1x1x8x128xf32>,
    %c0_21 = arith.constant 0 : index
    %c2 = arith.constant 2 : index
    %c0_22 = arith.constant 0 : index
    %c0_23 = arith.constant 0 : index
    %27 = vector.load %arg4[%c0_21, %c2, %c0_22, %c0_23] : memref<1x3x8x128xf32, #tpu.memory_space<vmem>>, vector<1x1x8x128xf32>
    %28 = vector.shape_cast %27 : vector<1x1x8x128xf32> to vector<8x128xf32>
    %cst_24 = arith.constant dense<0.000000e+00> : vector<8x128xf32>
    %29 = vector.multi_reduction <add>, %11, %cst_24 [0] : vector<1x8x128xf32> to vector<8x128xf32>
    %30 = arith.addf %28, %29 : vector<8x128xf32>
    %c0_25 = arith.constant 0 : index
    %c2_26 = arith.constant 2 : index
    %c0_27 = arith.constant 0 : index
    %c0_28 = arith.constant 0 : index
    %31 = vector.load %arg4[%c0_25, %c2_26, %c0_27, %c0_28] : memref<1x3x8x128xf32, #tpu.memory_space<vmem>>, vector<1x1x8x128xf32>
    %32 = vector.shape_cast %31 : vector<1x1x8x128xf32> to vector<8x128xf32>
    %33 = vector.shape_cast %30 : vector<8x128xf32> to vector<1x1x8x128xf32>
    tpu.vector_store %arg4[%c0_25, %c2_26, %c0_27, %c0_28], %33 {strides = array<i32>} : memref<1x3x8x128xf32, #tpu.memory_space<vmem>>, vector<1x1x8x128xf32>,
    return
  }
  func.func @transform_0(%arg0: i32, %arg1: i32) -> (i32, i32) {
    %c1_i32 = arith.constant 1 : i32
    %0 = arith.muli %arg0, %c1_i32 : i32
    %1 = arith.addi %0, %arg1 : i32
    %c0_i32 = arith.constant 0 : i32
    %c0_i32_0 = arith.constant 0 : i32
    return %1, %c0_i32 : i32, i32
  }
  func.func @transform_1(%arg0: i32, %arg1: i32) -> (i32, i32) {
    %c1_i32 = arith.constant 1 : i32
    %0 = arith.muli %arg0, %c1_i32 : i32
    %1 = arith.addi %0, %arg1 : i32
    %c0_i32 = arith.constant 0 : i32
    %c0_i32_0 = arith.constant 0 : i32
    return %1, %c0_i32 : i32, i32
  }
  func.func @transform_2(%arg0: i32, %arg1: i32) -> (i32, i32, i32, i32) {
    %c0_i32 = arith.constant 0 : i32
    %c0_i32_0 = arith.constant 0 : i32
    %c0_i32_1 = arith.constant 0 : i32
    %c0_i32_2 = arith.constant 0 : i32
    return %arg0, %c0_i32, %c0_i32_0, %c0_i32_1 : i32, i32, i32, i32
  }
}

</mosaic_0001>

<bundles_post_ra>
// kernel: dice_loss.1
= control target key start
LH: loop header
LB: loop body
LE: loop exit
PB: predicated region body
PF: predicated region fallthrough
CT: control target
= control target key end

     0   :  { %s131_s0 = inlined_call_operand.vmem [shape: f32[8,128], index: 0, kind: input, shape index: {}]   ;;  %s132_s1 = inlined_call_operand.vmem [shape: f32[8,128], index: 1, kind: input, shape index: {}]   ;;  %s133_s2 = inlined_call_operand.vmem [shape: f32[1,3,8,128], index: 2, kind: output, shape index: {}]  }
   0x1   :  { %v52_v0 = vld [vmem:[%s131_s0] sm:$0xff] }
   0x2   :  { %v59_v1 = vld [vmem:[%s132_s1] sm:$0xff]  ;;  %v91_v2 = vmul.f32 -1.442695, %v52_v0 }
   0x3   :  { %95 = vst [vmem:[%s133_s2 + $0x10] sm:$0xff] %v59_v1 }
   0x4   :  { %97 = vpow2.f32 %v91_v2 }
   0xe   :  { %v98_v3 = vpop.eup %97 }
   0xf   :  { %v56_v4 = vadd.f32 1.0, %v98_v3 }
  0x11   :  { %99 = vrcp.f32 %v56_v4 }
  0x1b   :  { %v100_v5 = vpop.eup %99 }
  0x1c   :  { %v61_v6 = vmul.f32 %v100_v5, %v59_v1  ;;  %93 = vst [vmem:[%s133_s2 + $0x8] sm:$0xff] %v100_v5 }
  0x1e   :  { %64 = vst [vmem:[%s133_s2] sm:$0xff] %v61_v6 }

</bundles_post_ra>
